<compile_context>
chip_gen: v7x
topology: tpu7x:2x2x1
jax: 0.10.0
libtpu: 0.0.40
codegen_flags: <defaults>
</compile_context>

<pallas_src>
import functools

import jax
import jax.numpy as jnp
from jax import lax
from jax.experimental import pallas as pl
from jax.experimental.pallas import tpu as pltpu


def _round_up(x, m):
    return (x + m - 1) // m * m


def _pick_l_tile(l_out):
    """Pick the output-length (lane-axis) tile. Prefer one full-width tile so no
    output padding / trailing slice is ever needed; otherwise big lane-dense tiles."""
    if l_out <= 2048:
        return l_out, l_out                      # single tile, no padding
    for t in (2048, 1024, 512):
        if l_out % t == 0:
            return t, l_out
    return 1024, _round_up(l_out, 1024)


def _conv_tile(w_ref, x_ref, *, cin, k, stride, tl, single_tile):
    """One (Cout, TL) conv tile: build the (K*Cin, TL) slab in VMEM from the
    input row (halo via lane-window slices) and issue a single MXU dot."""
    if single_tile:
        xrow = x_ref[...]                                        # (Cin, L_in)
        if stride == 1:
            cols = [xrow[:, kk:kk + tl] for kk in range(k)]
        else:
            span = (tl - 1) * stride + 1
            cols = [lax.slice(xrow, (0, kk), (cin, kk + span), (1, stride))
                    for kk in range(k)]
    else:
        base = pl.program_id(1) * (tl * stride)
        if stride == 1:
            cols = [x_ref[:, pl.ds(base + kk, tl)] for kk in range(k)]
        else:
            cols = [x_ref[:, pl.ds(base + kk, tl, stride)] for kk in range(k)]
    slab = jnp.concatenate(cols, axis=0)                         # (K*Cin, TL)
    return jnp.dot(w_ref[...], slab, preferred_element_type=jnp.float32)


def _stats_kernel(w_ref, x_ref, s_ref, *, cin, k, stride, tl, single_tile,
                  l_out, needs_mask):
    """Per-tile BN partial sums only — the conv output is never stored to HBM."""
    acc = _conv_tile(w_ref, x_ref, cin=cin, k=k, stride=stride, tl=tl,
                     single_tile=single_tile)                    # (Cout, TL) f32
    if needs_mask:
        pos = lax.broadcasted_iota(jnp.int32, acc.shape, 1) + pl.program_id(1) * tl
        acc = jnp.where(pos < l_out, acc, 0.0)
    s_ref[...] = jnp.concatenate(
        [jnp.sum(acc, axis=1, keepdims=True),
         jnp.sum(acc * acc, axis=1, keepdims=True)], axis=1)     # (Cout, 2)


def _out_kernel(w_ref, scale_ref, shift_ref, x_ref, o_ref, *, cin, k, stride,
                tl, single_tile, neg_slope):
    """Recompute the conv tile, apply fused BN affine + LeakyReLU, write the
    output directly in (N, Cout, L_out) layout."""
    acc = _conv_tile(w_ref, x_ref, cin=cin, k=k, stride=stride, tl=tl,
                     single_tile=single_tile)                    # (Cout, TL) f32
    y = acc * scale_ref[...] + shift_ref[...]
    o_ref[...] = jnp.where(y >= 0, y, neg_slope * y).astype(o_ref.dtype)


def conv1d_block(x, weight, gamma, beta, *, stride=1, padding=0, eps=1e-5,
                 neg_slope=0.01, compute_dtype=None):
    """x: (N, Cin, L), weight: (Cout, Cin, K), gamma/beta: (Cout,) -> (N, Cout, L_out)."""
    n, cin, l = x.shape
    cout, cin_w, k = weight.shape
    assert cin == cin_w
    l_out = (l + 2 * padding - k) // stride + 1
    assert l_out > 0
    m = n * l_out
    out_dtype = x.dtype

    if compute_dtype is not None:        # e.g. jnp.bfloat16 for full-rate MXU / fewer HBM bytes
        x = x.astype(compute_dtype)
        weight = weight.astype(compute_dtype)

    tl, l_out_pad = _pick_l_tile(l_out)
    num_l_tiles = l_out_pad // tl
    single_tile = num_l_tiles == 1
    needs_mask = l_out_pad != l_out

    # Conv padding (+ extra on the right so padded output positions, if any,
    # never read out of bounds when l_out is rounded up to the tile).
    l_in_needed = (l_out_pad - 1) * stride + k
    pad_r = padding + max(0, l_in_needed - (l + 2 * padding))
    if padding > 0 or pad_r > 0:
        x = jnp.pad(x, ((0, 0), (0, 0), (padding, pad_r)))
    l_in = x.shape[2]

    # Weight laid out so column kk*Cin + c matches the in-kernel slab row order.
    w2d = weight.transpose(0, 2, 1).reshape(cout, k * cin)

    cp = pltpu.CompilerParams(
        dimension_semantics=("parallel", "parallel"),   # grid shardable on v7x's 2 TCs
        vmem_limit_bytes=48 * 1024 * 1024)              # stays under v7x's 64 MiB/TC

    kern_kw = dict(cin=cin, k=k, stride=stride, tl=tl, single_tile=single_tile)
    grid = (n, num_l_tiles)
    w_spec = pl.BlockSpec((cout, k * cin), lambda i, j: (0, 0))
    x_spec = pl.BlockSpec((None, cin, l_in), lambda i, j: (i, 0, 0))

    # ---- pass 1: conv (computed, never stored) -> per-tile BN partial sums ----
    stats = pl.pallas_call(
        functools.partial(_stats_kernel, l_out=l_out, needs_mask=needs_mask,
                          **kern_kw),
        out_shape=jax.ShapeDtypeStruct((n, num_l_tiles, cout, 2), jnp.float32),
        grid=grid,
        in_specs=[w_spec, x_spec],
        out_specs=pl.BlockSpec((None, None, cout, 2), lambda i, j: (i, j, 0, 0)),
        compiler_params=cp,
    )(w2d, x)

    # ---- tiny cross-tile combine + BN fold (Cout-sized, pure XLA) -------------
    tot = jnp.sum(stats, axis=(0, 1))                    # (Cout, 2)
    mean = tot[:, 0] / m
    # TODO(synk): single-pass E[x^2]-mean^2 can lose precision if |mean| >> std.
    var = jnp.maximum(tot[:, 1] / m - mean * mean, 0.0)  # biased batch variance
    scale = gamma.astype(jnp.float32) * lax.rsqrt(var + eps)
    shift = beta.astype(jnp.float32) - mean * scale
    scale = scale.reshape(cout, 1)
    shift = shift.reshape(cout, 1)

    # ---- pass 2: recompute conv + fused BN affine + LeakyReLU, NCL output -----
    out = pl.pallas_call(
        functools.partial(_out_kernel, neg_slope=neg_slope, **kern_kw),
        out_shape=jax.ShapeDtypeStruct((n, cout, l_out_pad), out_dtype),
        grid=grid,
        in_specs=[w_spec,
                  pl.BlockSpec((cout, 1), lambda i, j: (0, 0)),
                  pl.BlockSpec((cout, 1), lambda i, j: (0, 0)),
                  x_spec],
        out_specs=pl.BlockSpec((None, cout, tl), lambda i, j: (i, 0, j)),
        compiler_params=cp,
    )(w2d, scale, shift, x)

    if needs_mask:                       # only for huge, non-tile-divisible l_out
        out = out[:, :, :l_out]
    return out


def _reference(x, weight, gamma, beta, *, stride, padding, eps=1e-5, neg_slope=0.01):
    # Pure-JAX reference mirroring PyTorch semantics (training-mode BN).
    y = lax.conv_general_dilated(
        x, weight, window_strides=(stride,), padding=[(padding, padding)],
        dimension_numbers=("NCH", "OIH", "NCH"))
    mean = jnp.mean(y, axis=(0, 2), keepdims=True)
    var = jnp.mean((y - mean) ** 2, axis=(0, 2), keepdims=True)
    yn = (y - mean) / jnp.sqrt(var + eps)
    yn = yn * gamma.reshape(1, -1, 1) + beta.reshape(1, -1, 1)
    return jnp.where(yn >= 0, yn, neg_slope * yn)


if __name__ == "__main__":
    key = jax.random.PRNGKey(0)
    kx, kw, kg, kb = jax.random.split(key, 4)

    # Conv1DBlock(in_channels=4, out_channels=8, kernel_size=3, stride=1, padding=1)
    N, CIN, COUT, L, K, STRIDE, PAD = 2, 4, 8, 16, 3, 1, 1

    x = jax.random.normal(kx, (N, CIN, L), dtype=jnp.float32)
    weight = 0.1 * jax.random.normal(kw, (COUT, CIN, K), dtype=jnp.float32)
    gamma = 1.0 + 0.1 * jax.random.normal(kg, (COUT,), dtype=jnp.float32)
    beta = 0.1 * jax.random.normal(kb, (COUT,), dtype=jnp.float32)

    out = conv1d_block(x, weight, gamma, beta, stride=STRIDE, padding=PAD)
    out = jax.block_until_ready(out)

    ref = _reference(x, weight, gamma, beta, stride=STRIDE, padding=PAD)
    assert out.shape == (N, COUT, (L + 2 * PAD - K) // STRIDE + 1)
    assert jnp.allclose(out, ref, atol=1e-4, rtol=1e-4)

    print("KERNEL_OK")
</pallas_src>

<mosaic_0001>
module attributes {stable_mosaic.version = 11 : i64} {
  func.func @_stats_kernel(%arg0: i32, %arg1: i32, %arg2: memref<8x12xf32, #tpu.memory_space<vmem>>, %arg3: memref<1x4x18xf32, #tpu.memory_space<vmem>>, %arg4: memref<1x1x8x2xf32, #tpu.memory_space<vmem>>) attributes {dimension_semantics = [#tpu.dimension_semantics<parallel>, #tpu.dimension_semantics<parallel>], iteration_bounds = array<i64: 2, 1>, scalar_prefetch = 0 : i64, scratch_operands = 0 : i64, tpu.core_type = #tpu.core_type<tc>, window_params = [{pipeline_mode = #tpu.pipeline_mode<synchronous>, transform_indices = @transform_0, window_bounds = array<i64: 8, 12>}, {transform_indices = @transform_1, window_bounds = array<i64: 1, 4, 18>}, {transform_indices = @transform_2, window_bounds = array<i64: 1, 1, 8, 2>}]} {
    %c0 = arith.constant 0 : index
    %c0_0 = arith.constant 0 : index
    %c0_1 = arith.constant 0 : index
    %0 = vector.load %arg3[%c0, %c0_0, %c0_1] : memref<1x4x18xf32, #tpu.memory_space<vmem>>, vector<1x4x18xf32>
    %1 = vector.shape_cast %0 : vector<1x4x18xf32> to vector<4x18xf32>
    %2 = vector.extract_strided_slice %1 {offsets = [0, 0], sizes = [4, 16], strides = [1, 1]} : vector<4x18xf32> to vector<4x16xf32>
    %3 = vector.extract_strided_slice %1 {offsets = [0, 1], sizes = [4, 16], strides = [1, 1]} : vector<4x18xf32> to vector<4x16xf32>
    %4 = vector.extract_strided_slice %1 {offsets = [0, 2], sizes = [4, 16], strides = [1, 1]} : vector<4x18xf32> to vector<4x16xf32>
    %5 = tpu.concatenate %2, %3, %4 in 0 : vector<4x16xf32>, vector<4x16xf32>, vector<4x16xf32> -> vector<12x16xf32>
    %c0_2 = arith.constant 0 : index
    %c0_3 = arith.constant 0 : index
    %6 = vector.load %arg2[%c0_2, %c0_3] : memref<8x12xf32, #tpu.memory_space<vmem>>, vector<8x12xf32>
    %cst = arith.constant dense<0.000000e+00> : vector<8x16xf32>
    %7 = tpu.matmul %6, %5, %cst {dimension_numbers = #tpu.dot_dimension_numbers<[1], [0], [0], [1], [0, 0, 1, 1], [], []>} : vector<8x12xf32>, vector<12x16xf32>, vector<8x16xf32> -> vector<8x16xf32>
    %cst_4 = arith.constant dense<0.000000e+00> : vector<8xf32>
    %8 = vector.multi_reduction <add>, %7, %cst_4 [1] : vector<8x16xf32> to vector<8xf32>
    %9 = vector.shape_cast %8 : vector<8xf32> to vector<8x1xf32>
    %10 = arith.mulf %7, %7 : vector<8x16xf32>
    %cst_5 = arith.constant dense<0.000000e+00> : vector<8xf32>
    %11 = vector.multi_reduction <add>, %10, %cst_5 [1] : vector<8x16xf32> to vector<8xf32>
    %12 = vector.shape_cast %11 : vector<8xf32> to vector<8x1xf32>
    %13 = tpu.concatenate %9, %12 in 1 : vector<8x1xf32>, vector<8x1xf32> -> vector<8x2xf32>
    %c0_6 = arith.constant 0 : index
    %c0_7 = arith.constant 0 : index
    %c0_8 = arith.constant 0 : index
    %c0_9 = arith.constant 0 : index
    %14 = vector.load %arg4[%c0_6, %c0_7, %c0_8, %c0_9] : memref<1x1x8x2xf32, #tpu.memory_space<vmem>>, vector<1x1x8x2xf32>
    %15 = vector.shape_cast %14 : vector<1x1x8x2xf32> to vector<8x2xf32>
    %16 = vector.shape_cast %13 : vector<8x2xf32> to vector<1x1x8x2xf32>
    tpu.vector_store %arg4[%c0_6, %c0_7, %c0_8, %c0_9], %16 {strides = array<i32>} : memref<1x1x8x2xf32, #tpu.memory_space<vmem>>, vector<1x1x8x2xf32>,
    return
  }
  func.func @transform_0(%arg0: i32, %arg1: i32) -> (i32, i32) {
    %c0_i32 = arith.constant 0 : i32
    %c0_i32_0 = arith.constant 0 : i32
    %c0_i32_1 = arith.constant 0 : i32
    return %c0_i32, %c0_i32_0 : i32, i32
  }
  func.func @transform_1(%arg0: i32, %arg1: i32) -> (i32, i32, i32) {
    %c0_i32 = arith.constant 0 : i32
    %c0_i32_0 = arith.constant 0 : i32
    %c0_i32_1 = arith.constant 0 : i32
    return %arg0, %c0_i32, %c0_i32_0 : i32, i32, i32
  }
  func.func @transform_2(%arg0: i32, %arg1: i32) -> (i32, i32, i32, i32) {
    %c0_i32 = arith.constant 0 : i32
    %c0_i32_0 = arith.constant 0 : i32
    %c0_i32_1 = arith.constant 0 : i32
    return %arg0, %arg1, %c0_i32, %c0_i32_0 : i32, i32, i32, i32
  }
}

</mosaic_0001>

<bundles_post_ra>
// kernel: tpu_custom_call.1
= control target key start
LH: loop header
LB: loop body
LE: loop exit
PB: predicated region body
PF: predicated region fallthrough
CT: control target
= control target key end

     0   :  { %7 = vsyncpa [#allocation3], 0  ;;  %s787_s0 = inlined_call_operand.hbm [shape: f32[8,12], index: 0, kind: input, shape index: {}]   ;;  %s788_s1 = inlined_call_operand.hbm [shape: f32[2,4,18], index: 1, kind: input, shape index: {}]   ;;  %s789_s2 = inlined_call_operand.vmem [shape: f32[2,1,8,2], index: 2, kind: output, shape index: {}]  }
   0x1   :  { %8 = vsyncpa [#allocation5], 0 }
   0x2   :  { %10 = vsyncpa [#allocation5 + $0x1], 0  ;;  %s624_s9 = smov 0   ;;  %s626_s10 = smov 0  }
   0x3   :  { %s628_s11 = smov 0   ;;  %s630_s12 = smov 0  }
   0x4   :  { %s632_s13 = smov 0   ;;  %s634_s14 = smov 0  }
   0x5 LB: > { %s386_s15 = sadd.s32 4294967295, %s599_s14   ;;  %p69_p0 = scmp.ne.s32.totalorder %s583_s10, %s579_s9  ;;  %s599_s14 = sphi %s634_s14, %s16_s14   ;;  %s595_s13 = sphi %s632_s13, %s808_s13   ;;  %s591_s12 = sphi %s630_s12, %s807_s12   ;;  %s587_s11 = sphi %s628_s11, %s806_s11   ;;  %s583_s10 = sphi %s626_s10, %s805_s10   ;;  %s579_s9 = sphi %s624_s9, %s804_s9  }
   0x6   : > { %p654_p1 = scmp.eq.s32.totalorder %s386_s15, 0  ;;  %p388_p2 = scmp.ge.s32.totalorder %s599_s14, 1 }
   0x7   : > { %p108_p3 = scmp.lt.s32.totalorder %s599_s14, 3  ;;  %s601_s19 = smov [#allocation2]  }
   0x8   : > { %s794_s16 = scalar_select %p654_p1, 1, 0 }
   0x9   : > { %p662_p4 = por %p654_p1, %p69_p0  ;;  %p666_p5 = pnand %p388_p2, %p108_p3 }
   0xa   : > { %s121_s20 = sshll.u32 %s601_s19, 4  ;;  %s28_s22 = sadd.s32 1, %s595_s13  ;;  %s122_s20 = int_to_ptr.vmem [resolvable:$true] %s121_s20 }
   0xb   : > { %s795_s17 = scalar_select %p662_p4, 1, 0 }
   0xc   : > { %s796_s18 = scalar_select %p666_p5, 1, 0 }
   0xd   : > { %p421_p6 = pneg %p666_p5  ;;  %s56_s23 = sadd.s32 1, %s587_s11 }
   0xe   : > { %p680_p8 = scmp.ge.s32.totalorder %s28_s22, 2  ;;  %s487_s27 = scalar_lea.hbm %s787_s0, 128 }
   0xf   : > { %p674_p7 = pnand %p421_p6, %p654_p1  ;;  %p488_p9 = scmp.ne.s32.totalorder %s787_s0, %s487_s27 }
  0x10   : > { %s798_s24 = scalar_select %p680_p8, 1, 0 }
  0x11   : > { %p489_p10 = pneg %p674_p7  ;;  %p494_p13 = scmp.lt.u32.totalorder %s487_s27, %s787_s0 }
  0x13   : > { %p490_p11 = pnand %p489_p10, %p488_p9 }
  0x15   : > { %p491_p12 = pneg %p490_p11 }
  0x17   : > { %p496_p0 = pnand %p494_p13, %p491_p12 }
  0x19   : > { %499 = shalt.err (!%p496_p0)
}
  0x1a   : > { %s500_s4 = scalar_lea.vmem %s122_s20, 128  ;;  %p508_p4 = scmp.lt.s32.totalorder %s122_s20, %s122_s20 }
  0x1b   : > { %p501_p2 = scmp.ne.s32.totalorder %s122_s20, %s500_s4  ;;  %p509_p1 = scmp.lt.s32.totalorder %s500_s4, %s500_s4 }
  0x1d   : > { %p503_p3 = pnand %p501_p2, %p489_p10  ;;  %p510_p5 = por %p509_p1, %p508_p4 }
  0x1f   : > { %p504_p6 = pneg %p503_p3 }
  0x21   : > { %p511_p8 = pnand %p510_p5, %p504_p6 }
  0x23   : > { %514 = shalt.err (!%p511_p8)
}
  0x24   : > { %424 = dma.hbm_to_vmem [thread:$0]  (!%p674_p7), %s787_s0, 128, %s122_s20, [#allocation3]  }
  0x25   : > { %p799_p9 = scmp.ne.s32.totalorder %s798_s24, 0  ;;  %p63_p1 = scmp.ne.s32.totalorder %s587_s11, %s583_s10 }
  0x26   : > { %p64_p4 = scmp.eq.s32.totalorder %s599_s14, 0  ;;  %p430_p5 = scmp.lt.s32.totalorder %s599_s14, 2 }
  0x27   : > { %s810_s22 = smov (%p799_p9, %s28_s22), 0  ;;  %s132_s8 = sand.u32 1, %s587_s11  }
  0x28   : > { %s53_s7 = ssub.s32 %s595_s13, %s810_s22  ;;  %p65_p10 = por %p64_p4, %p63_p1 }
  0x29   : > { %p54_p8 = scmp.eq.s32.totalorder %s53_s7, 0  ;;  %s392_s9 = sshll.u32 %s595_s13, 6 }
  0x2a   : > { %s391_s19 = sshll.u32 %s132_s8, 2  ;;  %s720_s20 = scalar_lea.hbm %s788_s1, %s392_s9 }
  0x2b   : > { %s715_s15 = scalar_select %p54_p8, %s587_s11, %s56_s23  }
  0x2c   : > { %s136_s24 = scalar_lea.vmem [#allocation4], %s391_s19  ;;  %p722_p7 = pnand %p430_p5, %p65_p10 }
  0x2d   : > { %s143_s26 = sshll.u32 %s136_s24, 4  ;;  %s133_s23 = scalar_lea.sflag [#allocation5], %s132_s8  ;;  %s726_s26 = int_to_ptr.vmem [resolvable:$true] %s143_s26 }
  0x2e   : > { %s515_s28 = scalar_lea.hbm %s720_s20, 64  ;;  %p517_p12 = pneg %p722_p7 }
  0x2f   : > { %p516_p11 = scmp.ne.s32.totalorder %s720_s20, %s515_s28  ;;  %s520_s3 = scalar_lea.hbm %s788_s1, 128 }
  0x30   : > { %p521_p2 = scmp.lt.u32.totalorder %s720_s20, %s788_s1  ;;  %p522_p3 = scmp.lt.u32.totalorder %s520_s3, %s515_s28 }
  0x31   : > { %p518_p13 = pnand %p517_p12, %p516_p11  ;;  %p524_p9 = scmp.lt.u32.totalorder %s515_s28, %s720_s20 }
  0x32   : > { %p523_p6 = por %p522_p3, %p521_p2 }
  0x33   : > { %p519_p0 = pneg %p518_p13 }
  0x34   : > { %p525_p1 = por %p524_p9, %p523_p6 }
  0x36   : > { %p526_p4 = pnand %p525_p1, %p519_p0 }
  0x38   : > { %529 = shalt.err (!%p526_p4)
}
  0x39   : > { %s530_s6 = scalar_lea.vmem %s726_s26, 64  ;;  %s602_s7 = smov [#allocation4]  }
  0x3a   : > { %p531_p5 = scmp.ne.s32.totalorder %s726_s26, %s530_s6  ;;  %s535_s8 = sshll.u32 %s602_s7, 4  ;;  %s536_s8 = int_to_ptr.vmem [resolvable:$false] %s535_s8 }
  0x3b   : > { %s537_s9 = scalar_lea.vmem %s536_s8, 128  ;;  %p538_p11 = scmp.lt.s32.totalorder %s726_s26, %s536_s8 }
  0x3c   : > { %p533_p8 = pnand %p531_p5, %p517_p12  ;;  %p539_p13 = scmp.lt.s32.totalorder %s537_s9, %s530_s6 }
  0x3e   : > { %p534_p10 = pneg %p533_p8  ;;  %p540_p2 = por %p539_p13, %p538_p11 }
  0x40   : > { %p541_p3 = pnand %p540_p2, %p534_p10 }
  0x42   : > { %544 = shalt.err (!%p541_p3)
}
  0x43   : > { %428 = dma.hbm_to_vmem [thread:$0]  (!%p722_p7), %s720_s20, 64, %s726_s26, %s133_s23  }
  0x44   : > { %p801_p0 = scmp.ne.s32.totalorder %s796_s18, 0 }
  0x45   : > { %p802_p12 = scmp.ne.s32.totalorder (!%p801_p0), %s794_s16, 0 }
  0x46   : > { %152 = sbr.rel (%p801_p0) target bundleno = 570 (0x23a), region = 28 }
  0x4d   : > { %570 = dma.done.wait (%p802_p12), [#allocation3], 128  }
  0x4e   : > { %572 = vsyncadd (%p802_p12), [#allocation3], 4294967168  ;;  %s158_s19 = sand.u32 1, %s583_s10   ;;  %p803_p6 = scmp.ne.s32.totalorder %s795_s17, 0 }
  0x4f   : > { %s395_s21 = sshll.u32 %s158_s19, 2  ;;  %s159_s25 = scalar_lea.sflag [#allocation5], %s158_s19 }
  0x50   : > { %s162_s24 = scalar_lea.vmem [#allocation4], %s395_s21 }
  0x51   : > { %574 = dma.done.wait (%p803_p6), %s159_s25, 64  }
  0x52   : > { %576 = vsyncadd (%p803_p6), %s159_s25, 4294967232  ;;  %v603_v0 = vmov 0.0|0.0   ;;  %vm604_vm0 = vmmov 0   ;;  %v605_v1 = vmov 0.0   ;;  %v192_v2 = vld [vmem:[%s162_s24] sm:$0xf] }
  0x53   : > { %411 = vmatprep.subr.bf16.mxu0 %v603_v0  ;;  %408 = vmatprep.mubr.msk.f32.mxu0 %vm604_vm0, %v605_v1  ;;  %v194_v3 = vrot.slane %v192_v2, 4  ;;  %s606_s16 = smov 127   ;;  %s607_s18 = smov 126   ;;  %vm200_vm1 = vcmask 1043456   ;;  %vm608_vm2 = vmmov 1   ;;  %v202_v8 = vld [vmem:[#allocation2] sm:$0xff] }
  0x54   : > { %vm413_vm3 = vmpackc.low %vm200_vm1, %vm608_vm2  ;;  %vm203_vm4 = vcmask 97280   ;;  %vm279_vm5 = vcmask 130048   ;;  %p185_p7 = scmp.lt.s32.totalorder %s591_s12, 1  ;;  %vm287_vm6 = vcmask 7168   ;;  %vm289_vm7 = vcmask 15360  }
  0x55   : > { %195 = vrot.lane.b32.xlu0 %v194_v3, %s606_s16 }
  0x56   : > { %s812_s12 = smov (!%p185_p7, %s591_s12), 1 }
  0x57   : > { %s396_s17 = sshll.u32 %s812_s12, 3 }
  0x58   : > { %s191_s27 = scalar_lea.vmem %s789_s2, %s396_s17 }
  0x59   : > { %198 = vrot.lane.b32.xlu0 %v192_v2, %s607_s18 }
  0xc7   : > { %v196_v4 = vpop.permute.xlu0 %195 }
  0xc8   : > { %v201_v5 = vsel %vm200_vm1, %v192_v2, %v196_v4 }
  0xcb   : > { %v199_v6 = vpop.permute.xlu0 %198 }
  0xcc   : > { %v412_v7 = vpack.c.bf16 %v199_v6, %v201_v5 }
  0xce   : > { %414 = vmatpush3.bf16.msk.msra.mxu0 %vm413_vm3, %v412_v7 }
  0xd1   : > { %409 = vmatmul.mubr.msk.f32.vlgmr.msra.gmra.mrb[0].mxu0 %vm203_vm4, %v202_v8 }
 0x1a4   : > { %v275_v9 = vpop.f32.mrb[0].mxu0 }
 0x1a5   : > { %v283_v10 = vmul.f32 %v275_v9, %v275_v9  ;;  %v410_v11 = vpop.f32.mrb[1].mxu0  ;;  %v280_v12 = vsel %vm279_vm5, %v275_v9, 0.0 }
 0x1a6   : > { %281 = vadd.xlane.f32.xlu1 %v280_v12 }
 0x1a7   : > { %v284_v13 = vsel %vm279_vm5, %v283_v10, 0.0 }
 0x1aa   : > { %285 = vadd.xlane.f32.xlu1 %v284_v13 }
 0x233   : > { %v282_v14 = vpop.xlane.xlu1 %281 }
 0x237   : > { %v286_v15 = vpop.xlane.xlu1 %285 }
 0x238   : > { %v288_v16 = vsel %vm287_vm6, %v282_v14, %v286_v15 }
 0x239   : > { %290 = vst.msk [vmem:[%s191_s27] sm:$0xff] %vm289_vm7, %v288_v16 }
 0x23a PF: > { %s16_s14 = sadd.s32 1, %s599_s14   ;;  %s804_s9 = smov %s583_s10 }
 0x23b   : > { %p13_p9 = scmp.ge.s32.totalorder %s16_s14, 4   ;;  %s805_s10 = smov %s587_s11 }
 0x23c   : > { %s806_s11 = smov %s715_s15  ;;  %s807_s12 = smov %s595_s13 }
 0x23d   : > { %s808_s13 = smov %s810_s22  ;;  %15 = sbr.rel (!%p13_p9) target bundleno = 5 (0x5), region = 73 }
 0x244   :  { %316 = vsyncpa [#allocation3], 1 }
 0x245   :  { %318 = vsyncpa [#allocation3 + $0x1], 1 }
 0x246   :  { %319 = vsyncpa [#allocation5], 1 }
 0x247   :  { %321 = vsyncpa [#allocation5 + $0x1], 1 }

</bundles_post_ra>
